<compile_context>
chip_gen: v7x
topology: tpu7x:2x2x1
jax: 0.10.0
libtpu: 0.0.40
codegen_flags: <defaults>
</compile_context>

<pallas_src>
import jax
import jax.numpy as jnp
from jax.experimental import pallas as pl
from jax.experimental.pallas import tpu as pltpu


# --------------------------------------------------------------------------
# Primary forward path: no kernel.  Bias.forward() is the identity on the
# parameter, so "do nothing" is the optimal implementation.
# --------------------------------------------------------------------------
def bias_forward(bias: jax.Array) -> jax.Array:
    """Pallas-free equivalent of Bias.forward(): returns the bias parameter."""
    return bias


# --------------------------------------------------------------------------
# Optional Pallas kernel, only for when an explicit kernel boundary is needed.
# --------------------------------------------------------------------------
def _bias_copy_kernel(bias_ref, out_ref):
    # Identity materialization of the (aliased) parameter tile.
    out_ref[...] = bias_ref[...]


def bias_forward_pallas(bias: jax.Array, *, block_elems: int = 512 * 1024) -> jax.Array:
    """Kernel-boundary version of Bias.forward().

    Uses a lane-dense 2-D view, io-aliasing, and row tiling for large
    num_features.  Returns a 1-D array identical to `bias`.
    """
    n = bias.shape[0]

    # Lane-dense layout: put 128 on the lane axis when possible; otherwise the
    # whole (small) vector is a single full-array block (no (8,128) violation
    # since block_shape == array shape).
    if n % 128 == 0 and n >= 128:
        cols = 128
    else:
        cols = n
    rows = n // cols
    x2d = bias.reshape(rows, cols)

    # Choose a row-block size: large blocks for HBM-scale biases (so Pallas
    # can double-buffer / overlap load+store), single block for small ones.
    target_rows = max(1, block_elems // max(cols, 1))
    if target_rows >= rows:
        block_rows = rows
    else:
        block_rows = max(8, (target_rows // 8) * 8)
        while block_rows > 8 and rows % block_rows != 0:
            block_rows -= 8
        if rows % block_rows != 0:
            block_rows = rows  # fall back to a single full-array block
    grid = (rows // block_rows,)

    out2d = pl.pallas_call(
        _bias_copy_kernel,
        out_shape=jax.ShapeDtypeStruct((rows, cols), bias.dtype),
        grid=grid,
        in_specs=[pl.BlockSpec((block_rows, cols), lambda i: (i, 0))],
        out_specs=pl.BlockSpec((block_rows, cols), lambda i: (i, 0)),
        # Output aliases the input parameter buffer: no second HBM allocation.
        input_output_aliases={0: 0},
        compiler_params=pltpu.CompilerParams(
            dimension_semantics=("parallel",),
        ),
    )(x2d)
    return out2d.reshape(n)


if __name__ == "__main__":
    num_features = 32

    # Deterministic inputs. nn.Parameter(torch.zeros(num_features)) initializes
    # to zeros; also test a random-valued parameter so the copy path is
    # non-trivially checked.
    key = jax.random.PRNGKey(0)
    bias_zeros = jnp.zeros((num_features,), dtype=jnp.float32)  # exact torch init
    bias_rand = jax.random.normal(key, (num_features,), dtype=jnp.float32)

    # Fast (kernel-free) forward path — the recommended implementation.
    out_fast_zeros = jax.block_until_ready(bias_forward(bias_zeros))
    out_fast_rand = jax.block_until_ready(bias_forward(bias_rand))
    assert out_fast_zeros.shape == (num_features,)
    assert out_fast_zeros.dtype == jnp.float32
    assert jnp.array_equal(out_fast_zeros, bias_zeros)
    assert jnp.array_equal(out_fast_rand, bias_rand)

    # Kernel-boundary path (small, non-multiple-of-128 case: single full block).
    out_k_zeros = jax.block_until_ready(bias_forward_pallas(bias_zeros))
    out_k_rand = jax.block_until_ready(bias_forward_pallas(bias_rand))
    assert out_k_zeros.shape == (num_features,)
    assert out_k_zeros.dtype == jnp.float32
    assert jnp.array_equal(out_k_zeros, bias_zeros)
    assert jnp.array_equal(out_k_rand, bias_rand)

    # Kernel-boundary path, lane-dense 2-D layout (num_features % 128 == 0).
    n_big = 1024
    bias_big = jax.random.normal(jax.random.PRNGKey(0), (n_big,), dtype=jnp.float32)
    out_big = jax.block_until_ready(bias_forward_pallas(bias_big))
    assert out_big.shape == (n_big,)
    assert jnp.array_equal(out_big, bias_big)

    print("KERNEL_OK")
</pallas_src>

<mosaic_0001>
module attributes {stable_mosaic.version = 11 : i64} {
  func.func @_bias_copy_kernel(%arg0: i32, %arg1: memref<1x32xf32, #tpu.memory_space<vmem>>, %arg2: memref<1x32xf32, #tpu.memory_space<vmem>>) attributes {dimension_semantics = [#tpu.dimension_semantics<parallel>], iteration_bounds = array<i64: 1>, scalar_prefetch = 0 : i64, scratch_operands = 0 : i64, tpu.core_type = #tpu.core_type<tc>, window_params = [{transform_indices = @transform_0, window_bounds = array<i64: 1, 32>}, {transform_indices = @transform_1, window_bounds = array<i64: 1, 32>}]} {
    %c0 = arith.constant 0 : index
    %c0_0 = arith.constant 0 : index
    %0 = vector.load %arg1[%c0, %c0_0] : memref<1x32xf32, #tpu.memory_space<vmem>>, vector<1x32xf32>
    %c0_1 = arith.constant 0 : index
    %c0_2 = arith.constant 0 : index
    %1 = vector.load %arg2[%c0_1, %c0_2] : memref<1x32xf32, #tpu.memory_space<vmem>>, vector<1x32xf32>
    tpu.vector_store %arg2[%c0_1, %c0_2], %0 {strides = array<i32>} : memref<1x32xf32, #tpu.memory_space<vmem>>, vector<1x32xf32>,
    return
  }
  func.func @transform_0(%arg0: i32) -> (i32, i32) {
    %c0_i32 = arith.constant 0 : i32
    %c0_i32_0 = arith.constant 0 : i32
    return %arg0, %c0_i32 : i32, i32
  }
  func.func @transform_1(%arg0: i32) -> (i32, i32) {
    %c0_i32 = arith.constant 0 : i32
    %c0_i32_0 = arith.constant 0 : i32
    return %arg0, %c0_i32 : i32, i32
  }
}

</mosaic_0001>

<bundles_post_ra>
// kernel: tpu_custom_call.1
= control target key start
LH: loop header
LB: loop body
LE: loop exit
PB: predicated region body
PF: predicated region fallthrough
CT: control target
= control target key end

     0   :  { %6 = vsyncpa [#allocation3], 0  ;;  %s125_s0 = inlined_call_operand.hbm [shape: f32[1,32], index: 0, kind: input, shape index: {}, may-alias: {0,1}]   ;;  %s126_s1 = inlined_call_operand.hbm [shape: f32[1,32], index: 1, kind: output, shape index: {}, may-alias: {0,1}]  }
   0x1   :  { %7 = vsyncpa [#allocation4], 0  ;;  %s89_s6 = smov [#allocation2]   ;;  %s41_s10 = scalar_lea.hbm %s125_s0, 16 }
   0x2   :  { %s14_s7 = sshll.u32 %s89_s6, 4  ;;  %p42_p0 = scmp.ne.s32.totalorder %s125_s0, %s41_s10  ;;  %s15_s7 = int_to_ptr.vmem [resolvable:$true] %s14_s7 }
   0x3   :  { %p45_p1 = scmp.lt.u32.totalorder %s41_s10, %s125_s0 }
   0x5   :  { %p47_p2 = pnand %p45_p1, %p42_p0 }
   0x7   :  { %50 = shalt.err (!%p47_p2)
}
   0x8   :  { %s51_s15 = scalar_lea.vmem %s15_s7, 16  ;;  %s55_s16 = scalar_lea.vmem %s15_s7, 32 }
   0x9   :  { %p52_p3 = scmp.ne.s32.totalorder %s15_s7, %s51_s15  ;;  %p56_p4 = scmp.lt.s32.totalorder %s15_s7, %s15_s7 }
   0xa   :  { %p57_p5 = scmp.lt.s32.totalorder %s55_s16, %s51_s15 }
   0xc   :  { %p58_p6 = por %p57_p5, %p56_p4 }
   0xe   :  { %p59_p7 = pnand %p58_p6, %p52_p3 }
  0x10   :  { %62 = shalt.err (!%p59_p7)
}
  0x11   :  { %17 = dma.hbm_to_vmem [thread:$0]  %s125_s0, 16, %s15_s7, [#allocation3]  }
  0x12   :  { %85 = dma.done.wait [#allocation3], 16  }
  0x13   :  { %86 = vsyncadd [#allocation3], 4294967280  ;;  %s90_s19 = smov [#allocation5]   ;;  %vm22_vm0 = vcmask 253952   ;;  %v21_v0 = vld [vmem:[#allocation2] sm:$0x1] }
  0x14   :  { %s30_s20 = sshll.u32 %s90_s19, 4  ;;  %23 = vst.msk [vmem:[#allocation5] sm:$0x1] %vm22_vm0, %v21_v0  ;;  %s31_s20 = int_to_ptr.vmem [resolvable:$true] %s30_s20 }
  0x15   :  { %s63_s21 = scalar_lea.vmem %s31_s20, 16  ;;  %s67_s22 = scalar_lea.vmem %s31_s20, 32 }
  0x16   :  { %p64_p8 = scmp.ne.s32.totalorder %s31_s20, %s63_s21  ;;  %p68_p9 = scmp.lt.s32.totalorder %s31_s20, %s31_s20 }
  0x17   :  { %p69_p10 = scmp.lt.s32.totalorder %s67_s22, %s63_s21 }
  0x19   :  { %p70_p11 = por %p69_p10, %p68_p9 }
  0x1b   :  { %p71_p12 = pnand %p70_p11, %p64_p8 }
  0x1d   :  { %74 = shalt.err (!%p71_p12)
}
  0x1e   :  { %s75_s0 = scalar_lea.hbm %s126_s1, 16 }
  0x1f   :  { %p76_p13 = scmp.ne.s32.totalorder %s126_s1, %s75_s0  ;;  %p79_p0 = scmp.lt.u32.totalorder %s75_s0, %s126_s1 }
  0x21   :  { %p81_p1 = pnand %p79_p0, %p76_p13 }
  0x23   :  { %84 = shalt.err (!%p81_p1)
}
  0x24   :  { %33 = dma.vmem_to_hbm [thread:$0]  %s31_s20, 16, %s126_s1, [#allocation4]  }
  0x25   :  { %87 = dma.done.wait [#allocation4], 16  }
  0x26   :  { %88 = vsyncadd [#allocation4], 4294967280 }
  0x27   :  { %37 = vsyncpa [#allocation3], 1 }
  0x28   :  { %38 = vsyncpa [#allocation4], 1 }

</bundles_post_ra>
